<compile_context>
chip_gen: v6e
topology: v6e:2x2x1
jax: 0.10.0
libtpu: 0.0.40
codegen_flags: <defaults>
</compile_context>

<pallas_src>
import functools

import jax
import jax.numpy as jnp
from jax.experimental import pallas as pl
from jax.experimental.pallas import tpu as pltpu

EPS = 1e-4


def _round_up(x: int, m: int) -> int:
    return (x + m - 1) // m * m


# ----------------------------- kernels -------------------------------------


def _sample_feature_single_k_kernel(x_ref, wt_ref, b_ref, o_ref):
    # x_ref:  (TILE_N, n_input)   activations (f32 or bf16)
    # wt_ref: (n_input, n_out_p)  pre-transposed weight, resident (constant idx)
    # b_ref:  (1, n_out_p)        bias (f32)
    # o_ref:  (TILE_N, n_out_p)   output tile
    v = jnp.dot(x_ref[...], wt_ref[...], preferred_element_type=jnp.float32)
    v = v + b_ref[...]
    o_ref[...] = (jnp.exp(v) + EPS).astype(o_ref.dtype)


def _sample_feature_multi_k_kernel(x_ref, wt_ref, b_ref, o_ref):
    # Split-K path: accumulate directly into the resident f32 output block
    # (out index_map is (i, 0), independent of k) — no scratch accumulator.
    k = pl.program_id(1)
    part = jnp.dot(x_ref[...], wt_ref[...], preferred_element_type=jnp.float32)

    @pl.when(k == 0)
    def _():
        o_ref[...] = part

    @pl.when(k != 0)
    def _():
        o_ref[...] = o_ref[...] + part

    @pl.when(k == pl.num_programs(1) - 1)
    def _():
        o_ref[...] = (jnp.exp(o_ref[...] + b_ref[...]) + EPS).astype(o_ref.dtype)


def _feature_kernel(p_ref, o_ref):
    # p_ref: (1, n_out_p) learned per-feature log-variance parameter.
    # exp runs once per tile on a single row, then a broadcast store fills the
    # (TILE_N, n_out_p) output tile (kernel is purely HBM-writeback bound).
    v_row = jnp.exp(p_ref[...].astype(jnp.float32)) + EPS
    o_ref[...] = jnp.broadcast_to(v_row, o_ref.shape).astype(o_ref.dtype)


# ----------------------------- tiling --------------------------------------

_VMEM_BUDGET = 20 << 20  # double-buffered working-set target (fits v7x easily)


def _choose_tiles(n_samples, n_input, n_out_p, x_isz, w_isz, o_isz, sub_mult,
                  k_tile_cap=None):
    # Prefer keeping the whole pre-transposed weight resident: weight block
    # index becomes constant and W is fetched from HBM exactly once.
    w_full = 2 * n_input * n_out_p * w_isz
    if w_full <= _VMEM_BUDGET // 2 and (k_tile_cap is None or n_input <= k_tile_cap):
        tile_k = n_input                     # single K step, no K padding
    else:
        per_k_row = 2 * n_out_p * w_isz
        tile_k = max(128, (_VMEM_BUDGET // 2) // per_k_row // 128 * 128)
        tile_k = min(tile_k, _round_up(n_input, 128))
        if k_tile_cap is not None:
            tile_k = min(tile_k, k_tile_cap)

    w_bytes = 2 * tile_k * n_out_p * w_isz
    per_n_row = 2 * tile_k * x_isz + 2 * n_out_p * o_isz
    tile_n = max(sub_mult,
                 (_VMEM_BUDGET - w_bytes) // per_n_row // sub_mult * sub_mult)
    tile_n = min(tile_n, 1024)
    tile_n = min(tile_n, _round_up(n_samples, sub_mult))

    # v7x has 2 TensorCores: make sure the "parallel" sample axis has >= 2
    # tiles whenever there are enough rows to split (no-op on v5e/v6e).
    if n_samples >= 2 * sub_mult and pl.cdiv(n_samples, tile_n) < 2:
        tile_n = _round_up(pl.cdiv(n_samples, 2), sub_mult)

    return tile_n, tile_k


# ----------------------------- wrappers ------------------------------------


@functools.partial(
    jax.jit, static_argnames=("mode", "compute_dtype", "out_dtype", "k_tile_cap")
)
def var_encoder_forward(x, params, mode="sample_feature", compute_dtype=None,
                        out_dtype=jnp.float32, k_tile_cap=None):
    """Pallas implementation of VarEncoder.forward.

    x      : (n_samples, n_input) float32
    params : mode == 'sample_feature': {'weight': (n_output, n_input),
                                        'bias':   (1, n_output)}
             mode == 'feature':        {'var_param': (1, n_output)}
    compute_dtype : optional dtype (e.g. jnp.bfloat16) for matmul operands;
                    accumulation stays f32.  (Recommended on v5e.)
    out_dtype     : output dtype (bf16 halves writeback when downstream allows).
    k_tile_cap    : optional cap on the K tile (mainly for testing split-K).
    """
    n_samples = x.shape[0]

    if mode == "sample_feature":
        w = params["weight"]          # (n_output, n_input), PyTorch layout
        b = params["bias"]            # (1, n_output)
        n_output, n_input = w.shape
        n_out_p = _round_up(n_output, 128)          # lane-dense output width

        cdt = jnp.dtype(compute_dtype) if compute_dtype is not None else x.dtype
        sub_mult = 16 if cdt == jnp.dtype(jnp.bfloat16) else 8
        x_isz = cdt.itemsize
        w_isz = cdt.itemsize
        o_isz = jnp.dtype(out_dtype).itemsize

        tile_n, tile_k = _choose_tiles(
            n_samples, n_input, n_out_p, x_isz, w_isz, 4, sub_mult, k_tile_cap
        )
        single_k = tile_k == n_input
        n_in_pad = n_input if single_k else _round_up(n_input, tile_k)
        n_i = pl.cdiv(n_samples, tile_n)
        n_k = 1 if single_k else n_in_pad // tile_k

        # ---- layout plumbing (one-time, small weight-side ops) --------------
        wt = jnp.pad(w.T.astype(cdt),
                     ((0, n_in_pad - n_input), (0, n_out_p - n_output)))
        b_p = jnp.pad(b.astype(jnp.float32), ((0, 0), (0, n_out_p - n_output)))
        x_p = x.astype(cdt)                      # no-op when compute_dtype=None
        if n_in_pad != n_input:                  # K is zero-padded only if split
            x_p = jnp.pad(x_p, ((0, 0), (0, n_in_pad - n_input)))

        # ---- VMEM footprint & advisory cost ---------------------------------
        fp = (2 * tile_n * tile_k * x_isz
              + 2 * tile_k * n_out_p * w_isz
              + 2 * tile_n * n_out_p * (o_isz if single_k else 4)
              + 2 * n_out_p * 4)
        vmem_limit = min(max(int(fp * 1.5), 8 << 20), 48 << 20)
        bytes_acc = (n_samples * n_in_pad * x_isz
                     + (1 if single_k else n_i) * n_in_pad * n_out_p * w_isz
                     + n_samples * n_out_p * (o_isz if single_k else 4)
                     + n_out_p * 4)
        cost = pl.CostEstimate(
            flops=2 * n_samples * n_in_pad * n_out_p,
            transcendentals=n_samples * n_out_p,
            bytes_accessed=bytes_acc,
        )

        if single_k:
            out = pl.pallas_call(
                _sample_feature_single_k_kernel,
                out_shape=jax.ShapeDtypeStruct((n_samples, n_out_p), out_dtype),
                grid=(n_i,),
                in_specs=[
                    pl.BlockSpec((tile_n, n_input), lambda i: (i, 0)),
                    pl.BlockSpec((n_input, n_out_p), lambda i: (0, 0)),
                    pl.BlockSpec((1, n_out_p), lambda i: (0, 0)),
                ],
                out_specs=pl.BlockSpec((tile_n, n_out_p), lambda i: (i, 0)),
                compiler_params=pltpu.CompilerParams(
                    dimension_semantics=("parallel",),
                    vmem_limit_bytes=vmem_limit,
                ),
                cost_estimate=cost,
            )(x_p, wt, b_p)
            return out[:, :n_output]
        else:
            # Split-K: accumulate into the resident f32 output block.
            out = pl.pallas_call(
                _sample_feature_multi_k_kernel,
                out_shape=jax.ShapeDtypeStruct((n_samples, n_out_p), jnp.float32),
                grid=(n_i, n_k),
                in_specs=[
                    pl.BlockSpec((tile_n, tile_k), lambda i, k: (i, k)),
                    pl.BlockSpec((tile_k, n_out_p), lambda i, k: (k, 0)),
                    pl.BlockSpec((1, n_out_p), lambda i, k: (0, 0)),
                ],
                out_specs=pl.BlockSpec((tile_n, n_out_p), lambda i, k: (i, 0)),
                compiler_params=pltpu.CompilerParams(
                    dimension_semantics=("parallel", "arbitrary"),
                    vmem_limit_bytes=vmem_limit,
                ),
                cost_estimate=cost,
            )(x_p, wt, b_p)
            out = out[:, :n_output]
            if out.dtype != jnp.dtype(out_dtype):
                out = out.astype(out_dtype)
            return out

    elif mode == "feature":
        p = params["var_param"]       # (1, n_output)
        n_output = p.shape[1]
        n_out_p = _round_up(n_output, 128)
        o_isz = jnp.dtype(out_dtype).itemsize

        tile_n = min(1024, _round_up(n_samples, 8))
        if n_samples >= 16 and pl.cdiv(n_samples, tile_n) < 2:
            tile_n = _round_up(pl.cdiv(n_samples, 2), 8)
        n_i = pl.cdiv(n_samples, tile_n)

        p_p = jnp.pad(p.astype(jnp.float32), ((0, 0), (0, n_out_p - n_output)))
        fp = 2 * n_out_p * 4 + 2 * tile_n * n_out_p * o_isz
        vmem_limit = min(max(int(fp * 1.5), 8 << 20), 48 << 20)

        out = pl.pallas_call(
            _feature_kernel,
            out_shape=jax.ShapeDtypeStruct((n_samples, n_out_p), out_dtype),
            grid=(n_i,),
            in_specs=[pl.BlockSpec((1, n_out_p), lambda i: (0, 0))],
            out_specs=pl.BlockSpec((tile_n, n_out_p), lambda i: (i, 0)),
            compiler_params=pltpu.CompilerParams(
                dimension_semantics=("parallel",),
                vmem_limit_bytes=vmem_limit,
            ),
            cost_estimate=pl.CostEstimate(
                flops=n_samples * n_out_p,
                transcendentals=n_out_p,
                bytes_accessed=n_out_p * 4 + n_samples * n_out_p * o_isz,
            ),
        )(p_p)
        return out[:, :n_output]

    else:
        raise ValueError("Mode not recognised.")


# ----------------------------- init + main ----------------------------------


def init_params(key, n_input, n_output, mode):
    """Deterministic parameter init (mirrors PyTorch default Linear init)."""
    if mode == "sample_feature":
        kw, kb = jax.random.split(key)
        bound = 1.0 / jnp.sqrt(jnp.float32(n_input))
        weight = jax.random.uniform(
            kw, (n_output, n_input), jnp.float32, -bound, bound
        )
        bias = jax.random.uniform(kb, (1, n_output), jnp.float32, -bound, bound)
        return {"weight": weight, "bias": bias}
    elif mode == "feature":
        # PyTorch init is torch.zeros(1, n_output)
        return {"var_param": jnp.zeros((1, n_output), jnp.float32)}
    else:
        raise ValueError("Mode not recognised.")


if __name__ == "__main__":
    key = jax.random.PRNGKey(0)
    k_x, k_p, k_x2, k_p2 = jax.random.split(key, 4)

    # ---- mode = 'sample_feature' (f32, single-K fast path) ------------------
    n_samples, n_input, n_output = 8, 32, 16
    x = jax.random.normal(k_x, (n_samples, n_input), jnp.float32)
    params_sf = init_params(k_p, n_input, n_output, "sample_feature")

    v_sf = jax.block_until_ready(var_encoder_forward(x, params_sf))
    ref_sf = jnp.exp(x @ params_sf["weight"].T + params_sf["bias"]) + EPS
    assert v_sf.shape == (n_samples, n_output)
    assert jnp.allclose(v_sf, ref_sf, atol=1e-5, rtol=1e-5)

    # ---- bf16 operand path (f32 accumulate) ---------------------------------
    v_bf = jax.block_until_ready(
        var_encoder_forward(x, params_sf, compute_dtype=jnp.bfloat16)
    )
    assert v_bf.shape == (n_samples, n_output)
    assert jnp.allclose(v_bf, ref_sf, atol=1e-1, rtol=1e-1)  # bf16 tolerance

    # ---- split-K path (accumulate directly in resident f32 output) ----------
    ns2, ni2, no2 = 64, 384, 200
    x2 = jax.random.normal(k_x2, (ns2, ni2), jnp.float32) * 0.1
    params2 = init_params(k_p2, ni2, no2, "sample_feature")
    v2 = jax.block_until_ready(
        var_encoder_forward(x2, params2, k_tile_cap=128)
    )
    ref2 = jnp.exp(x2 @ params2["weight"].T + params2["bias"]) + EPS
    assert v2.shape == (ns2, no2)
    assert jnp.allclose(v2, ref2, atol=1e-4, rtol=1e-4)

    # ---- mode = 'feature' ----------------------------------------------------
    params_f = init_params(k_p, n_input, n_output, "feature")
    v_f = jax.block_until_ready(var_encoder_forward(x, params_f, mode="feature"))
    ref_f = jnp.exp(
        jnp.broadcast_to(params_f["var_param"], (n_samples, n_output))
    ) + EPS
    assert v_f.shape == (n_samples, n_output)
    assert jnp.allclose(v_f, ref_f, atol=1e-6, rtol=1e-6)

    print("KERNEL_OK")
</pallas_src>

<mosaic_0001>
module attributes {stable_mosaic.version = 11 : i64} {
  func.func @_sample_feature_single_k_kernel(%arg0: i32, %arg1: memref<8x32xf32, #tpu.memory_space<vmem>>, %arg2: memref<32x128xf32, #tpu.memory_space<vmem>>, %arg3: memref<1x128xf32, #tpu.memory_space<vmem>>, %arg4: memref<8x128xf32, #tpu.memory_space<vmem>>) attributes {dimension_semantics = [#tpu.dimension_semantics<parallel>], iteration_bounds = array<i64: 1>, scalar_prefetch = 0 : i64, scratch_operands = 0 : i64, tpu.core_type = #tpu.core_type<tc>, window_params = [{transform_indices = @transform_0, window_bounds = array<i64: 8, 32>}, {pipeline_mode = #tpu.pipeline_mode<synchronous>, transform_indices = @transform_1, window_bounds = array<i64: 32, 128>}, {pipeline_mode = #tpu.pipeline_mode<synchronous>, transform_indices = @transform_2, window_bounds = array<i64: 1, 128>}, {transform_indices = @transform_3, window_bounds = array<i64: 8, 128>}]} {
    %c0 = arith.constant 0 : index
    %c0_0 = arith.constant 0 : index
    %0 = vector.load %arg1[%c0, %c0_0] : memref<8x32xf32, #tpu.memory_space<vmem>>, vector<8x32xf32>
    %c0_1 = arith.constant 0 : index
    %c0_2 = arith.constant 0 : index
    %1 = vector.load %arg2[%c0_1, %c0_2] : memref<32x128xf32, #tpu.memory_space<vmem>>, vector<32x128xf32>
    %cst = arith.constant dense<0.000000e+00> : vector<8x128xf32>
    %2 = tpu.matmul %0, %1, %cst {dimension_numbers = #tpu.dot_dimension_numbers<[1], [0], [0], [1], [0, 0, 1, 1], [], []>} : vector<8x32xf32>, vector<32x128xf32>, vector<8x128xf32> -> vector<8x128xf32>
    %c0_3 = arith.constant 0 : index
    %c0_4 = arith.constant 0 : index
    %3 = vector.load %arg3[%c0_3, %c0_4] : memref<1x128xf32, #tpu.memory_space<vmem>>, vector<1x128xf32>
    %4 = vector.broadcast %3 : vector<1x128xf32> to vector<8x128xf32>
    %5 = arith.addf %2, %4 : vector<8x128xf32>
    %6 = math.exp %5 : vector<8x128xf32>
    %cst_5 = arith.constant 9.99999974E-5 : f32
    %7 = vector.broadcast %cst_5 : f32 to vector<8x128xf32>
    %8 = arith.addf %6, %7 : vector<8x128xf32>
    %c0_6 = arith.constant 0 : index
    %c0_7 = arith.constant 0 : index
    %9 = vector.load %arg4[%c0_6, %c0_7] : memref<8x128xf32, #tpu.memory_space<vmem>>, vector<8x128xf32>
    tpu.vector_store %arg4[%c0_6, %c0_7], %8 {strides = array<i32>} : memref<8x128xf32, #tpu.memory_space<vmem>>, vector<8x128xf32>,
    return
  }
  func.func @transform_0(%arg0: i32) -> (i32, i32) {
    %c0_i32 = arith.constant 0 : i32
    %c0_i32_0 = arith.constant 0 : i32
    return %arg0, %c0_i32 : i32, i32
  }
  func.func @transform_1(%arg0: i32) -> (i32, i32) {
    %c0_i32 = arith.constant 0 : i32
    %c0_i32_0 = arith.constant 0 : i32
    %c0_i32_1 = arith.constant 0 : i32
    return %c0_i32, %c0_i32_0 : i32, i32
  }
  func.func @transform_2(%arg0: i32) -> (i32, i32) {
    %c0_i32 = arith.constant 0 : i32
    %c0_i32_0 = arith.constant 0 : i32
    %c0_i32_1 = arith.constant 0 : i32
    return %c0_i32, %c0_i32_0 : i32, i32
  }
  func.func @transform_3(%arg0: i32) -> (i32, i32) {
    %c0_i32 = arith.constant 0 : i32
    %c0_i32_0 = arith.constant 0 : i32
    return %arg0, %c0_i32 : i32, i32
  }
}

</mosaic_0001>

<bundles_post_ra>
// kernel: var_encoder_forward.1
= control target key start
LH: loop header
LB: loop body
LE: loop exit
PB: predicated region body
PF: predicated region fallthrough
CT: control target
= control target key end

     0   :  { %v164_v1 = vmov 0.0   ;;  %vm165_vm0 = vmmov 0   ;;  %s208_s0 = inlined_call_operand.vmem [shape: f32[8,32], index: 0, kind: input, shape index: {}]   ;;  %s209_s1 = inlined_call_operand.vmem [shape: f32[32,128], index: 1, kind: input, shape index: {}]   ;;  %s210_s2 = inlined_call_operand.vmem [shape: f32[1,128], index: 2, kind: input, shape index: {}]   ;;  %s211_s3 = inlined_call_operand.hbm [shape: f32[8,128], index: 3, kind: output, shape index: {}]  }
   0x1   :  { %v19_v0 = vld [vmem:[%s209_s1 + $0x18] sm:$0xff]  ;;  %126 = vmatprep.subr.mxu0 %v164_v1  ;;  %v18_v2 = vld [vmem:[%s209_s1 + $0x10] sm:$0xff]  ;;  %134 = vmatprep.mubr.msk.f32.mxu0 %vm165_vm0, %v164_v1 }
   0x2   :  { %127 = vmatpush3.msra.mxu0 %v19_v0 }
   0x3   :  { %8 = vsyncpa [#allocation3], 0  ;;  %128 = vmatprep.subr.mxu0 %v164_v1  ;;  %v17_v3 = vld [vmem:[%s209_s1 + $0x8] sm:$0xff]  ;;  %v16_v4 = vld [vmem:[%s209_s1] sm:$0xff]  ;;  %vm27_vm1 = vcmask 261120   ;;  %s166_s24 = smov [#allocation2]  }
   0x4   :  { %129 = vmatpush3.msra.mxu0 %v18_v2  ;;  %v15_v5 = vld [vmem:[%s208_s0] sm:$0xff]  ;;  %s111_s1 = sshll.u32 %s166_s24, 4  ;;  %s112_s1 = int_to_ptr.vmem [resolvable:$true] %s111_s1 }
   0x5   :  { %130 = vmatprep.subr.mxu0 %v164_v1  ;;  %v119_v6 = vld [vmem:[%s210_s2] ss:$0 sm:$0xff]  ;;  %s142_s0 = scalar_lea.vmem %s112_s1, 128  ;;  %p147_p1 = scmp.lt.s32.totalorder %s112_s1, %s112_s1 }
   0x6   :  { %131 = vmatpush3.msra.mxu0 %v17_v3  ;;  %p143_p0 = scmp.ne.s32.totalorder %s112_s1, %s142_s0  ;;  %p148_p2 = scmp.lt.s32.totalorder %s142_s0, %s142_s0 }
   0x7   :  { %132 = vmatprep.subr.mxu0 %v164_v1 }
   0x8   :  { %133 = vmatpush3.msra.mxu0 %v16_v4  ;;  %p149_p3 = por %p148_p2, %p147_p1 }
   0x9   :  { %135 = vmatmul.mubr.msk.f32.vlgmr.msra.gmra.mxu0 %vm27_vm1, %v15_v5 }
   0xa   :  { %p150_p4 = pnand %p149_p3, %p143_p0 }
  0xc9   :  { %v97_v7 = vpop.f32.mrf.mxu0 }
  0xca   :  { %v98_v8 = vadd.f32 %v119_v6, %v97_v7 }
  0xcb   :  { %v136_v9 = vpop.f32.mrf.mxu0 }
  0xcc   :  { %v101_v10 = vmul.f32 1.442695, %v98_v8 }
  0xce   :  { %140 = vpow2.f32 %v101_v10 }
  0xdb   :  { %v141_v11 = vpop.eup %140 }
  0xdc   :  { %v103_v12 = vadd.f32 0.0001, %v141_v11 }
  0xde   :  { %104 = vst [vmem:[#allocation2] sm:$0xff] %v103_v12 }
  0xdf   :  { %153 = shalt.err (!%p150_p4)
}
  0xe0   :  { %114 = dma.vmem_to_hbm [thread:$0]  %s112_s1, 128, %s211_s3, [#allocation3]  }
  0xe1   :  { %162 = dma.done.wait [#allocation3], 128  }
  0xe2   :  { %163 = vsyncadd [#allocation3], 4294967168 }
  0xe3   :  { %118 = vsyncpa [#allocation3], 1 }

</bundles_post_ra>
